<compile_context>
chip_gen: v6e
topology: v6e:2x2x1
jax: 0.10.0
libtpu: 0.0.40
codegen_flags: <defaults>
</compile_context>

<pallas_src>
import jax
import jax.numpy as jnp
from jax.experimental import pallas as pl
from jax.experimental.pallas import tpu as pltpu


def _round_up(x, m):
    return ((x + m - 1) // m) * m


def _phi_embedding_kernel(x_ref, w1_ref, b1_ref, w2_ref, b2_ref, w3_ref, b3_ref, o_ref):
    # x_ref : (TB, A_pad)            current row tile
    # w*_ref: (d_in_pad, d_out_pad)  resident, already transposed + padded
    # b*_ref: (1, d_out_pad)         resident, padded
    # o_ref : (TB, O_pad)
    x = x_ref[...]

    # Linear 1 + SiLU
    h = jnp.dot(x, w1_ref[...], preferred_element_type=jnp.float32) + b1_ref[...]
    h = h * jax.nn.sigmoid(h)

    # Linear 2 + SiLU
    h = jnp.dot(h, w2_ref[...], preferred_element_type=jnp.float32) + b2_ref[...]
    h = h * jax.nn.sigmoid(h)

    # Linear 3
    y = jnp.dot(h, w3_ref[...], preferred_element_type=jnp.float32) + b3_ref[...]
    o_ref[...] = y.astype(o_ref.dtype)


def phi_embedding_forward(alpha, w1, b1, w2, b2, w3, b3, *, block_rows=256):
    """Pallas forward for PhiEmbedding.

    alpha: (..., alpha_dim) float32
    w1: (in_dim, alpha_dim), b1: (in_dim,)     -- PyTorch Linear layout (out, in)
    w2: (in_dim, in_dim),    b2: (in_dim,)
    w3: (out_dim, in_dim),   b3: (out_dim,)
    returns: (..., out_dim)
    """
    orig_shape = alpha.shape
    alpha_dim = orig_shape[-1]
    x = alpha.reshape(-1, alpha_dim)
    B = x.shape[0]

    in_dim = w1.shape[0]
    out_dim = w3.shape[0]
    assert w1.shape == (in_dim, alpha_dim)
    assert w2.shape == (in_dim, in_dim)
    assert w3.shape == (out_dim, in_dim)

    # Lane-align the feature dims (128).  Zero padding is exact for this MLP.
    a_pad = _round_up(alpha_dim, 128)
    i_pad = _round_up(in_dim, 128)
    o_pad = _round_up(out_dim, 128)

    # Transpose once so the kernel runs row-major x @ W (lane = out features),
    # then pad to the aligned sizes.
    w1t = jnp.pad(jnp.transpose(w1), ((0, a_pad - alpha_dim), (0, i_pad - in_dim)))
    w2t = jnp.pad(jnp.transpose(w2), ((0, i_pad - in_dim), (0, i_pad - in_dim)))
    w3t = jnp.pad(jnp.transpose(w3), ((0, i_pad - in_dim), (0, o_pad - out_dim)))
    b1r = jnp.pad(b1.reshape(1, in_dim), ((0, 0), (0, i_pad - in_dim)))
    b2r = jnp.pad(b2.reshape(1, in_dim), ((0, 0), (0, i_pad - in_dim)))
    b3r = jnp.pad(b3.reshape(1, out_dim), ((0, 0), (0, o_pad - out_dim)))

    # Row tiling: sublane-aligned (multiple of 8) tiles, batch padded to a
    # whole number of tiles.
    tb = min(block_rows, _round_up(B, 8))
    tb = _round_up(tb, 8)
    b_pad = _round_up(B, tb)
    x = jnp.pad(x, ((0, b_pad - B), (0, a_pad - alpha_dim)))
    grid = (b_pad // tb,)

    out = pl.pallas_call(
        _phi_embedding_kernel,
        out_shape=jax.ShapeDtypeStruct((b_pad, o_pad), alpha.dtype),
        grid=grid,
        in_specs=[
            pl.BlockSpec((tb, a_pad), lambda i: (i, 0)),      # x tile
            pl.BlockSpec((a_pad, i_pad), lambda i: (0, 0)),   # W1 (resident)
            pl.BlockSpec((1, i_pad), lambda i: (0, 0)),       # b1
            pl.BlockSpec((i_pad, i_pad), lambda i: (0, 0)),   # W2
            pl.BlockSpec((1, i_pad), lambda i: (0, 0)),       # b2
            pl.BlockSpec((i_pad, o_pad), lambda i: (0, 0)),   # W3
            pl.BlockSpec((1, o_pad), lambda i: (0, 0)),       # b3
        ],
        out_specs=pl.BlockSpec((tb, o_pad), lambda i: (i, 0)),
        compiler_params=pltpu.CompilerParams(
            dimension_semantics=("parallel",),
        ),
    )(x, w1t, b1r, w2t, b2r, w3t, b3r)

    out = out[:B, :out_dim]
    return out.reshape(orig_shape[:-1] + (out_dim,))


def phi_embedding_reference(alpha, w1, b1, w2, b2, w3, b3):
    """Plain-JAX reference mirroring the PyTorch forward."""
    h = alpha @ w1.T + b1
    h = h * jax.nn.sigmoid(h)
    h = h @ w2.T + b2
    h = h * jax.nn.sigmoid(h)
    return h @ w3.T + b3


if __name__ == "__main__":
    # Small shapes consistent with the module: alpha_dim small, in_dim=out_dim=100 (defaults).
    batch, alpha_dim, in_dim, out_dim = 16, 8, 100, 100

    key = jax.random.PRNGKey(0)
    ka, k1, kb1, k2, kb2, k3, kb3 = jax.random.split(key, 7)
    alpha = jax.random.normal(ka, (batch, alpha_dim), dtype=jnp.float32)
    w1 = 0.1 * jax.random.normal(k1, (in_dim, alpha_dim), dtype=jnp.float32)
    b1 = 0.1 * jax.random.normal(kb1, (in_dim,), dtype=jnp.float32)
    w2 = 0.1 * jax.random.normal(k2, (in_dim, in_dim), dtype=jnp.float32)
    b2 = 0.1 * jax.random.normal(kb2, (in_dim,), dtype=jnp.float32)
    w3 = 0.1 * jax.random.normal(k3, (out_dim, in_dim), dtype=jnp.float32)
    b3 = 0.1 * jax.random.normal(kb3, (out_dim,), dtype=jnp.float32)

    y = phi_embedding_forward(alpha, w1, b1, w2, b2, w3, b3)
    y = jax.block_until_ready(y)

    y_ref = phi_embedding_reference(alpha, w1, b1, w2, b2, w3, b3)
    assert y.shape == (batch, out_dim)
    assert jnp.allclose(y, y_ref, rtol=1e-4, atol=1e-4), "Pallas output mismatch vs reference"

    print("KERNEL_OK")
</pallas_src>

<mosaic_0001>
module attributes {stable_mosaic.version = 11 : i64} {
  func.func @_phi_embedding_kernel(%arg0: i32, %arg1: memref<16x128xf32, #tpu.memory_space<vmem>>, %arg2: memref<128x128xf32, #tpu.memory_space<vmem>>, %arg3: memref<1x128xf32, #tpu.memory_space<vmem>>, %arg4: memref<128x128xf32, #tpu.memory_space<vmem>>, %arg5: memref<1x128xf32, #tpu.memory_space<vmem>>, %arg6: memref<128x128xf32, #tpu.memory_space<vmem>>, %arg7: memref<1x128xf32, #tpu.memory_space<vmem>>, %arg8: memref<16x128xf32, #tpu.memory_space<vmem>>) attributes {dimension_semantics = [#tpu.dimension_semantics<parallel>], iteration_bounds = array<i64: 1>, scalar_prefetch = 0 : i64, scratch_operands = 0 : i64, tpu.core_type = #tpu.core_type<tc>, window_params = [{transform_indices = @transform_0, window_bounds = array<i64: 16, 128>}, {pipeline_mode = #tpu.pipeline_mode<synchronous>, transform_indices = @transform_1, window_bounds = array<i64: 128, 128>}, {pipeline_mode = #tpu.pipeline_mode<synchronous>, transform_indices = @transform_2, window_bounds = array<i64: 1, 128>}, {pipeline_mode = #tpu.pipeline_mode<synchronous>, transform_indices = @transform_3, window_bounds = array<i64: 128, 128>}, {pipeline_mode = #tpu.pipeline_mode<synchronous>, transform_indices = @transform_4, window_bounds = array<i64: 1, 128>}, {pipeline_mode = #tpu.pipeline_mode<synchronous>, transform_indices = @transform_5, window_bounds = array<i64: 128, 128>}, {pipeline_mode = #tpu.pipeline_mode<synchronous>, transform_indices = @transform_6, window_bounds = array<i64: 1, 128>}, {transform_indices = @transform_7, window_bounds = array<i64: 16, 128>}]} {
    %c0 = arith.constant 0 : index
    %c0_0 = arith.constant 0 : index
    %0 = vector.load %arg1[%c0, %c0_0] : memref<16x128xf32, #tpu.memory_space<vmem>>, vector<16x128xf32>
    %c0_1 = arith.constant 0 : index
    %c0_2 = arith.constant 0 : index
    %1 = vector.load %arg2[%c0_1, %c0_2] : memref<128x128xf32, #tpu.memory_space<vmem>>, vector<128x128xf32>
    %cst = arith.constant dense<0.000000e+00> : vector<16x128xf32>
    %2 = tpu.matmul %0, %1, %cst {dimension_numbers = #tpu.dot_dimension_numbers<[1], [0], [0], [1], [0, 0, 1, 1], [], []>} : vector<16x128xf32>, vector<128x128xf32>, vector<16x128xf32> -> vector<16x128xf32>
    %c0_3 = arith.constant 0 : index
    %c0_4 = arith.constant 0 : index
    %3 = vector.load %arg3[%c0_3, %c0_4] : memref<1x128xf32, #tpu.memory_space<vmem>>, vector<1x128xf32>
    %4 = vector.broadcast %3 : vector<1x128xf32> to vector<16x128xf32>
    %5 = arith.addf %2, %4 : vector<16x128xf32>
    %6 = arith.negf %5 : vector<16x128xf32>
    %7 = math.exp %6 : vector<16x128xf32>
    %cst_5 = arith.constant 1.000000e+00 : f32
    %8 = vector.broadcast %cst_5 : f32 to vector<16x128xf32>
    %9 = arith.addf %8, %7 : vector<16x128xf32>
    %10 = arith.divf %8, %9 : vector<16x128xf32>
    %11 = arith.mulf %5, %10 : vector<16x128xf32>
    %c0_6 = arith.constant 0 : index
    %c0_7 = arith.constant 0 : index
    %12 = vector.load %arg4[%c0_6, %c0_7] : memref<128x128xf32, #tpu.memory_space<vmem>>, vector<128x128xf32>
    %cst_8 = arith.constant dense<0.000000e+00> : vector<16x128xf32>
    %13 = tpu.matmul %11, %12, %cst_8 {dimension_numbers = #tpu.dot_dimension_numbers<[1], [0], [0], [1], [0, 0, 1, 1], [], []>} : vector<16x128xf32>, vector<128x128xf32>, vector<16x128xf32> -> vector<16x128xf32>
    %c0_9 = arith.constant 0 : index
    %c0_10 = arith.constant 0 : index
    %14 = vector.load %arg5[%c0_9, %c0_10] : memref<1x128xf32, #tpu.memory_space<vmem>>, vector<1x128xf32>
    %15 = vector.broadcast %14 : vector<1x128xf32> to vector<16x128xf32>
    %16 = arith.addf %13, %15 : vector<16x128xf32>
    %17 = arith.negf %16 : vector<16x128xf32>
    %18 = math.exp %17 : vector<16x128xf32>
    %cst_11 = arith.constant 1.000000e+00 : f32
    %19 = vector.broadcast %cst_11 : f32 to vector<16x128xf32>
    %20 = arith.addf %19, %18 : vector<16x128xf32>
    %21 = arith.divf %19, %20 : vector<16x128xf32>
    %22 = arith.mulf %16, %21 : vector<16x128xf32>
    %c0_12 = arith.constant 0 : index
    %c0_13 = arith.constant 0 : index
    %23 = vector.load %arg6[%c0_12, %c0_13] : memref<128x128xf32, #tpu.memory_space<vmem>>, vector<128x128xf32>
    %cst_14 = arith.constant dense<0.000000e+00> : vector<16x128xf32>
    %24 = tpu.matmul %22, %23, %cst_14 {dimension_numbers = #tpu.dot_dimension_numbers<[1], [0], [0], [1], [0, 0, 1, 1], [], []>} : vector<16x128xf32>, vector<128x128xf32>, vector<16x128xf32> -> vector<16x128xf32>
    %c0_15 = arith.constant 0 : index
    %c0_16 = arith.constant 0 : index
    %25 = vector.load %arg7[%c0_15, %c0_16] : memref<1x128xf32, #tpu.memory_space<vmem>>, vector<1x128xf32>
    %26 = vector.broadcast %25 : vector<1x128xf32> to vector<16x128xf32>
    %27 = arith.addf %24, %26 : vector<16x128xf32>
    %c0_17 = arith.constant 0 : index
    %c0_18 = arith.constant 0 : index
    %28 = vector.load %arg8[%c0_17, %c0_18] : memref<16x128xf32, #tpu.memory_space<vmem>>, vector<16x128xf32>
    tpu.vector_store %arg8[%c0_17, %c0_18], %27 {strides = array<i32>} : memref<16x128xf32, #tpu.memory_space<vmem>>, vector<16x128xf32>,
    return
  }
  func.func @transform_0(%arg0: i32) -> (i32, i32) {
    %c0_i32 = arith.constant 0 : i32
    %c0_i32_0 = arith.constant 0 : i32
    return %arg0, %c0_i32 : i32, i32
  }
  func.func @transform_1(%arg0: i32) -> (i32, i32) {
    %c0_i32 = arith.constant 0 : i32
    %c0_i32_0 = arith.constant 0 : i32
    %c0_i32_1 = arith.constant 0 : i32
    return %c0_i32, %c0_i32_0 : i32, i32
  }
  func.func @transform_2(%arg0: i32) -> (i32, i32) {
    %c0_i32 = arith.constant 0 : i32
    %c0_i32_0 = arith.constant 0 : i32
    %c0_i32_1 = arith.constant 0 : i32
    return %c0_i32, %c0_i32_0 : i32, i32
  }
  func.func @transform_3(%arg0: i32) -> (i32, i32) {
    %c0_i32 = arith.constant 0 : i32
    %c0_i32_0 = arith.constant 0 : i32
    %c0_i32_1 = arith.constant 0 : i32
    return %c0_i32, %c0_i32_0 : i32, i32
  }
  func.func @transform_4(%arg0: i32) -> (i32, i32) {
    %c0_i32 = arith.constant 0 : i32
    %c0_i32_0 = arith.constant 0 : i32
    %c0_i32_1 = arith.constant 0 : i32
    return %c0_i32, %c0_i32_0 : i32, i32
  }
  func.func @transform_5(%arg0: i32) -> (i32, i32) {
    %c0_i32 = arith.constant 0 : i32
    %c0_i32_0 = arith.constant 0 : i32
    %c0_i32_1 = arith.constant 0 : i32
    return %c0_i32, %c0_i32_0 : i32, i32
  }
  func.func @transform_6(%arg0: i32) -> (i32, i32) {
    %c0_i32 = arith.constant 0 : i32
    %c0_i32_0 = arith.constant 0 : i32
    %c0_i32_1 = arith.constant 0 : i32
    return %c0_i32, %c0_i32_0 : i32, i32
  }
  func.func @transform_7(%arg0: i32) -> (i32, i32) {
    %c0_i32 = arith.constant 0 : i32
    %c0_i32_0 = arith.constant 0 : i32
    return %arg0, %c0_i32 : i32, i32
  }
}

</mosaic_0001>

<bundles_post_ra>
// kernel: tpu_custom_call.1
= control target key start
LH: loop header
LB: loop body
LE: loop exit
PB: predicated region body
PF: predicated region fallthrough
CT: control target
= control target key end

     0   :  { %12 = vsyncpa [#allocation3], 0  ;;  %s810_s0 = inlined_call_operand.hbm [shape: f32[16,128], index: 0, kind: input, shape index: {}]   ;;  %s811_s1 = inlined_call_operand.hbm [shape: f32[128,128], index: 1, kind: input, shape index: {}]   ;;  %s812_s2 = inlined_call_operand.vmem [shape: f32[1,128], index: 2, kind: input, shape index: {}]   ;;  %s813_s3 = inlined_call_operand.hbm [shape: f32[128,128], index: 3, kind: input, shape index: {}]   ;;  %s814_s4 = inlined_call_operand.vmem [shape: f32[1,128], index: 4, kind: input, shape index: {}]   ;;  %s815_s5 = inlined_call_operand.hbm [shape: f32[128,128], index: 5, kind: input, shape index: {}]   ;;  %s816_s6 = inlined_call_operand.vmem [shape: f32[1,128], index: 6, kind: input, shape index: {}]   ;;  %s817_s7 = inlined_call_operand.hbm [shape: f32[16,128], index: 7, kind: output, shape index: {}]  }
   0x1   :  { %13 = vsyncpa [#allocation6], 0 }
   0x2   :  { %14 = vsyncpa [#allocation9], 0 }
   0x3   :  { %15 = vsyncpa [#allocation4], 0  ;;  %s724_s24 = smov [#allocation5]   ;;  %s725_s26 = smov [#allocation2]  }
   0x4   :  { %s33_s25 = sshll.u32 %s724_s24, 4  ;;  %s21_s27 = sshll.u32 %s725_s26, 4  ;;  %s34_s25 = int_to_ptr.vmem [resolvable:$true] %s33_s25  ;;  %s22_s27 = int_to_ptr.vmem [resolvable:$true] %s21_s27 }
   0x5   :  { %s624_s28 = scalar_lea.vmem %s34_s25, 2048  ;;  %p629_p1 = scmp.lt.s32.totalorder %s34_s25, %s34_s25 }
   0x6   :  { %p625_p0 = scmp.ne.s32.totalorder %s34_s25, %s624_s28  ;;  %p630_p2 = scmp.lt.s32.totalorder %s624_s28, %s624_s28 }
   0x8   :  { %p631_p3 = por %p630_p2, %p629_p1 }
   0xa   :  { %p632_p4 = pnand %p631_p3, %p625_p0 }
   0xc   :  { %635 = shalt.err (!%p632_p4)
}
   0xd   :  { %s726_s29 = smov 128   ;;  %s727_s30 = smov 8  }
   0xe   :  { %39 = dma.hbm_to_vmem [thread:$0]  %s811_s1, 2048, %s34_s25, [#allocation6], %s726_s29, %s726_s29, %s727_s30  }
   0xf   :  { %s644_s10 = scalar_lea.vmem %s22_s27, 256  ;;  %p649_p6 = scmp.lt.s32.totalorder %s22_s27, %s22_s27 }
  0x10   :  { %p645_p5 = scmp.ne.s32.totalorder %s22_s27, %s644_s10  ;;  %p650_p7 = scmp.lt.s32.totalorder %s644_s10, %s644_s10 }
  0x12   :  { %p651_p8 = por %p650_p7, %p649_p6 }
  0x14   :  { %p652_p9 = pnand %p651_p8, %p645_p5 }
  0x16   :  { %655 = shalt.err (!%p652_p9)
}
  0x17   :  { %27 = dma.hbm_to_vmem [thread:$0]  %s810_s0, 256, %s22_s27, [#allocation3], %s726_s29, %s726_s29, %s727_s30  }
  0x18   :  { %s728_s13 = smov [#allocation7]   ;;  %s729_s15 = smov [#allocation8]  }
  0x19   :  { %s47_s14 = sshll.u32 %s728_s13, 4  ;;  %s61_s16 = sshll.u32 %s729_s15, 4  ;;  %s48_s14 = int_to_ptr.vmem [resolvable:$true] %s47_s14  ;;  %s62_s16 = int_to_ptr.vmem [resolvable:$true] %s61_s16 }
  0x1a   :  { %s664_s1 = scalar_lea.vmem %s48_s14, 2048  ;;  %p669_p11 = scmp.lt.s32.totalorder %s48_s14, %s48_s14 }
  0x1b   :  { %p665_p10 = scmp.ne.s32.totalorder %s48_s14, %s664_s1  ;;  %p670_p12 = scmp.lt.s32.totalorder %s664_s1, %s664_s1 }
  0x1d   :  { %p671_p13 = por %p670_p12, %p669_p11 }
  0x1f   :  { %p672_p0 = pnand %p671_p13, %p665_p10 }
  0x21   :  { %675 = shalt.err (!%p672_p0)
}
  0x22   :  { %53 = dma.hbm_to_vmem [thread:$0]  %s813_s3, 2048, %s48_s14, [#allocation6], %s726_s29, %s726_s29, %s727_s30  }
  0x23   :  { %s684_s0 = scalar_lea.vmem %s62_s16, 2048  ;;  %p689_p2 = scmp.lt.s32.totalorder %s62_s16, %s62_s16 }
  0x24   :  { %p685_p1 = scmp.ne.s32.totalorder %s62_s16, %s684_s0  ;;  %p690_p3 = scmp.lt.s32.totalorder %s684_s0, %s684_s0 }
  0x26   :  { %p691_p4 = por %p690_p3, %p689_p2 }
  0x28   :  { %p692_p5 = pnand %p691_p4, %p685_p1 }
  0x2a   :  { %695 = shalt.err (!%p692_p5)
}
  0x2b   :  { %67 = dma.hbm_to_vmem [thread:$0]  %s815_s5, 2048, %s62_s16, [#allocation9], %s726_s29, %s726_s29, %s727_s30  }
  0x2c   :  { %716 = dma.done.wait [#allocation3], 256  }
  0x2d   :  { %717 = vsyncadd [#allocation3], 4294967040 }
  0x2e   :  { %718 = dma.done.wait [#allocation6], 4096  }
  0x2f   :  { %719 = vsyncadd [#allocation6], 4294963200 }
  0x30   :  { %720 = dma.done.wait [#allocation9], 2048  }
  0x31   :  { %721 = vsyncadd [#allocation9], 4294965248  ;;  %v99_v0 = vld [vmem:[#allocation5 + $0x78] sm:$0xff]  ;;  %v98_v1 = vld [vmem:[#allocation5 + $0x70] sm:$0xff]  ;;  %s730_s23 = smov [#allocation10]  }
  0x32   :  { %488 = vmatprep.subr.mxu0 %v99_v0  ;;  %v97_v2 = vld [vmem:[#allocation5 + $0x68] sm:$0xff]  ;;  %v96_v3 = vld [vmem:[#allocation5 + $0x60] sm:$0xff]  ;;  %v82_v4 = vld [vmem:[#allocation2] sm:$0xff]  ;;  %s413_s24 = sshll.u32 %s730_s23, 4  ;;  %s414_s24 = int_to_ptr.vmem [resolvable:$true] %s413_s24 }
  0x33   :  { %489 = vmatpush3.msra.mxu0 %v99_v0  ;;  %v95_v5 = vld [vmem:[#allocation5 + $0x58] sm:$0xff]  ;;  %520 = vmatprep.mubr.f32.mxu0 %v82_v4  ;;  %v94_v6 = vld [vmem:[#allocation5 + $0x50] sm:$0xff]  ;;  %v93_v7 = vld [vmem:[#allocation5 + $0x48] sm:$0xff]  ;;  %s696_s25 = scalar_lea.vmem %s414_s24, 256  ;;  %p701_p7 = scmp.lt.s32.totalorder %s414_s24, %s414_s24 }
  0x34   :  { %490 = vmatprep.subr.mxu0 %v98_v1  ;;  %v92_v8 = vld [vmem:[#allocation5 + $0x40] sm:$0xff]  ;;  %v91_v9 = vld [vmem:[#allocation5 + $0x38] sm:$0xff]  ;;  %v90_v10 = vld [vmem:[#allocation5 + $0x30] sm:$0xff]  ;;  %p697_p6 = scmp.ne.s32.totalorder %s414_s24, %s696_s25  ;;  %p702_p8 = scmp.lt.s32.totalorder %s696_s25, %s696_s25 }
  0x35   :  { %491 = vmatpush3.msra.mxu0 %v98_v1  ;;  %v89_v11 = vld [vmem:[#allocation5 + $0x28] sm:$0xff]  ;;  %v88_v12 = vld [vmem:[#allocation5 + $0x20] sm:$0xff]  ;;  %v87_v13 = vld [vmem:[#allocation5 + $0x18] sm:$0xff] }
  0x36   :  { %492 = vmatprep.subr.mxu0 %v97_v2  ;;  %v86_v14 = vld [vmem:[#allocation5 + $0x10] sm:$0xff]  ;;  %v85_v15 = vld [vmem:[#allocation5 + $0x8] sm:$0xff]  ;;  %v84_v16 = vld [vmem:[#allocation5] sm:$0xff]  ;;  %p703_p9 = por %p702_p8, %p701_p7 }
  0x37   :  { %493 = vmatpush3.msra.mxu0 %v97_v2  ;;  %v83_v17 = vld [vmem:[#allocation2 + $0x8] sm:$0xff]  ;;  %v210_v19 = vld [vmem:[#allocation7 + $0x70] sm:$0xff]  ;;  %v209_v20 = vld [vmem:[#allocation7 + $0x68] sm:$0xff] }
  0x38   :  { %494 = vmatprep.subr.mxu0 %v96_v3  ;;  %v211_v18 = vld [vmem:[#allocation7 + $0x78] sm:$0xff]  ;;  %v208_v21 = vld [vmem:[#allocation7 + $0x60] sm:$0xff]  ;;  %v206_v23 = vld [vmem:[#allocation7 + $0x50] sm:$0xff]  ;;  %p704_p10 = pnand %p703_p9, %p697_p6 }
  0x39   :  { %495 = vmatpush3.msra.mxu0 %v96_v3  ;;  %523 = vmatprep.subr.mxu1 %v211_v18  ;;  %v207_v22 = vld [vmem:[#allocation7 + $0x58] sm:$0xff]  ;;  %v205_v24 = vld [vmem:[#allocation7 + $0x48] sm:$0xff]  ;;  %v204_v25 = vld [vmem:[#allocation7 + $0x40] sm:$0xff] }
  0x3a   :  { %496 = vmatprep.subr.mxu0 %v95_v5  ;;  %524 = vmatpush3.msra.mxu1 %v211_v18  ;;  %v203_v26 = vld [vmem:[#allocation7 + $0x38] sm:$0xff]  ;;  %v202_v27 = vld [vmem:[#allocation7 + $0x30] sm:$0xff]  ;;  %v201_v28 = vld [vmem:[#allocation7 + $0x28] sm:$0xff] }
  0x3b   :  { %497 = vmatpush3.msra.mxu0 %v95_v5  ;;  %525 = vmatprep.subr.mxu1 %v210_v19  ;;  %v200_v29 = vld [vmem:[#allocation7 + $0x20] sm:$0xff]  ;;  %v199_v30 = vld [vmem:[#allocation7 + $0x18] sm:$0xff]  ;;  %v198_v31 = vld [vmem:[#allocation7 + $0x10] sm:$0xff] }
  0x3c   :  { %498 = vmatprep.subr.mxu0 %v94_v6  ;;  %526 = vmatpush3.msra.mxu1 %v210_v19  ;;  %v197_v32 = vld [vmem:[#allocation7 + $0x8] sm:$0xff]  ;;  %v196_v33 = vld [vmem:[#allocation7] sm:$0xff]  ;;  %v427_v34 = vld [vmem:[%s812_s2] ss:$0 sm:$0xff] }
  0x3d   :  { %499 = vmatpush3.msra.mxu0 %v94_v6  ;;  %527 = vmatprep.subr.mxu1 %v209_v20  ;;  %v323_v49 = vld [vmem:[#allocation8 + $0x78] sm:$0xff]  ;;  %v322_v50 = vld [vmem:[#allocation8 + $0x70] sm:$0xff]  ;;  %v321_v51 = vld [vmem:[#allocation8 + $0x68] sm:$0xff] }
  0x3e   :  { %500 = vmatprep.subr.mxu0 %v93_v7  ;;  %528 = vmatpush3.msra.mxu1 %v209_v20  ;;  %v320_v52 = vld [vmem:[#allocation8 + $0x60] sm:$0xff]  ;;  %v319_v53 = vld [vmem:[#allocation8 + $0x58] sm:$0xff]  ;;  %v318_v54 = vld [vmem:[#allocation8 + $0x50] sm:$0xff] }
  0x3f   :  { %501 = vmatpush3.msra.mxu0 %v93_v7  ;;  %529 = vmatprep.subr.mxu1 %v208_v21  ;;  %v317_v55 = vld [vmem:[#allocation8 + $0x48] sm:$0xff]  ;;  %v316_v56 = vld [vmem:[#allocation8 + $0x40] sm:$0xff]  ;;  %v315_v57 = vld [vmem:[#allocation8 + $0x38] sm:$0xff] }
  0x40   :  { %502 = vmatprep.subr.mxu0 %v92_v8  ;;  %530 = vmatpush3.msra.mxu1 %v208_v21  ;;  %v314_v58 = vld [vmem:[#allocation8 + $0x30] sm:$0xff]  ;;  %v313_v59 = vld [vmem:[#allocation8 + $0x28] sm:$0xff]  ;;  %v312_v60 = vld [vmem:[#allocation8 + $0x20] sm:$0xff] }
  0x41   :  { %503 = vmatpush3.msra.mxu0 %v92_v8  ;;  %531 = vmatprep.subr.mxu1 %v207_v22  ;;  %v311_v61 = vld [vmem:[#allocation8 + $0x18] sm:$0xff]  ;;  %v310_v62 = vld [vmem:[#allocation8 + $0x10] sm:$0xff]  ;;  %v309_v63 = vld [vmem:[#allocation8 + $0x8] sm:$0xff] }
  0x42   :  { %504 = vmatprep.subr.mxu0 %v91_v9  ;;  %532 = vmatpush3.msra.mxu1 %v207_v22  ;;  %v308_v0 = vld [vmem:[#allocation8] sm:$0xff]  ;;  %v430_v1 = vld [vmem:[%s814_s4] ss:$0 sm:$0xff] }
  0x43   :  { %505 = vmatpush3.msra.mxu0 %v91_v9  ;;  %533 = vmatprep.subr.mxu1 %v206_v23 }
  0x44   :  { %506 = vmatprep.subr.mxu0 %v90_v10  ;;  %534 = vmatpush3.msra.mxu1 %v206_v23 }
  0x45   :  { %507 = vmatpush3.msra.mxu0 %v90_v10  ;;  %535 = vmatprep.subr.mxu1 %v205_v24 }
  0x46   :  { %508 = vmatprep.subr.mxu0 %v89_v11  ;;  %536 = vmatpush3.msra.mxu1 %v205_v24 }
  0x47   :  { %509 = vmatpush3.msra.mxu0 %v89_v11  ;;  %537 = vmatprep.subr.mxu1 %v204_v25 }
  0x48   :  { %510 = vmatprep.subr.mxu0 %v88_v12  ;;  %538 = vmatpush3.msra.mxu1 %v204_v25 }
  0x49   :  { %511 = vmatpush3.msra.mxu0 %v88_v12  ;;  %539 = vmatprep.subr.mxu1 %v203_v26 }
  0x4a   :  { %512 = vmatprep.subr.mxu0 %v87_v13  ;;  %540 = vmatpush3.msra.mxu1 %v203_v26 }
  0x4b   :  { %513 = vmatpush3.msra.mxu0 %v87_v13  ;;  %541 = vmatprep.subr.mxu1 %v202_v27 }
  0x4c   :  { %514 = vmatprep.subr.mxu0 %v86_v14  ;;  %542 = vmatpush3.msra.mxu1 %v202_v27 }
  0x4d   :  { %515 = vmatpush3.msra.mxu0 %v86_v14  ;;  %543 = vmatprep.subr.mxu1 %v201_v28 }
  0x4e   :  { %516 = vmatprep.subr.mxu0 %v85_v15  ;;  %544 = vmatpush3.msra.mxu1 %v201_v28 }
  0x4f   :  { %517 = vmatpush3.msra.mxu0 %v85_v15  ;;  %545 = vmatprep.subr.mxu1 %v200_v29 }
  0x50   :  { %518 = vmatprep.subr.mxu0 %v84_v16  ;;  %546 = vmatpush3.msra.mxu1 %v200_v29 }
  0x51   :  { %519 = vmatpush3.msra.mxu0 %v84_v16  ;;  %547 = vmatprep.subr.mxu1 %v199_v30  ;;  %v433_v16 = vld [vmem:[%s816_s6] ss:$0 sm:$0xff] }
  0x52   :  { %521 = vmatmul.mubr.f32.vlgmr.msra.gmra.mxu0 %v83_v17  ;;  %548 = vmatpush3.msra.mxu1 %v199_v30 }
  0x53   :  { %549 = vmatprep.subr.mxu1 %v198_v31  ;;  %558 = vmatprep.subr.mxu0 %v323_v49 }
  0x54   :  { %550 = vmatpush3.msra.mxu1 %v198_v31  ;;  %559 = vmatpush3.msra.mxu0 %v323_v49 }
  0x55   :  { %551 = vmatprep.subr.mxu1 %v197_v32  ;;  %560 = vmatprep.subr.mxu0 %v322_v50 }
  0x56   :  { %552 = vmatpush3.msra.mxu1 %v197_v32  ;;  %561 = vmatpush3.msra.mxu0 %v322_v50 }
  0x57   :  { %553 = vmatprep.subr.mxu1 %v196_v33  ;;  %562 = vmatprep.subr.mxu0 %v321_v51 }
  0x58   :  { %554 = vmatpush3.msra.mxu1 %v196_v33  ;;  %563 = vmatpush3.msra.mxu0 %v321_v51 }
  0x59   :  { %564 = vmatprep.subr.mxu0 %v320_v52 }
  0x5a   :  { %565 = vmatpush3.msra.mxu0 %v320_v52 }
  0x5b   :  { %566 = vmatprep.subr.mxu0 %v319_v53 }
  0x5c   :  { %567 = vmatpush3.msra.mxu0 %v319_v53 }
  0x5d   :  { %568 = vmatprep.subr.mxu0 %v318_v54 }
  0x5e   :  { %569 = vmatpush3.msra.mxu0 %v318_v54 }
  0x5f   :  { %570 = vmatprep.subr.mxu0 %v317_v55 }
  0x60   :  { %571 = vmatpush3.msra.mxu0 %v317_v55 }
  0x61   :  { %572 = vmatprep.subr.mxu0 %v316_v56 }
  0x62   :  { %573 = vmatpush3.msra.mxu0 %v316_v56 }
  0x63   :  { %574 = vmatprep.subr.mxu0 %v315_v57 }
  0x64   :  { %575 = vmatpush3.msra.mxu0 %v315_v57 }
  0x65   :  { %576 = vmatprep.subr.mxu0 %v314_v58 }
  0x66   :  { %577 = vmatpush3.msra.mxu0 %v314_v58 }
  0x67   :  { %578 = vmatprep.subr.mxu0 %v313_v59 }
  0x68   :  { %579 = vmatpush3.msra.mxu0 %v313_v59 }
  0x69   :  { %580 = vmatprep.subr.mxu0 %v312_v60 }
  0x6a   :  { %581 = vmatpush3.msra.mxu0 %v312_v60 }
  0x6b   :  { %582 = vmatprep.subr.mxu0 %v311_v61 }
  0x6c   :  { %583 = vmatpush3.msra.mxu0 %v311_v61 }
  0x6d   :  { %584 = vmatprep.subr.mxu0 %v310_v62 }
  0x6e   :  { %585 = vmatpush3.msra.mxu0 %v310_v62 }
  0x6f   :  { %586 = vmatprep.subr.mxu0 %v309_v63 }
  0x70   :  { %587 = vmatpush3.msra.mxu0 %v309_v63 }
  0x71   :  { %588 = vmatprep.subr.mxu0 %v308_v0 }
  0x72   :  { %589 = vmatpush3.msra.mxu0 %v308_v0 }
 0x112   :  { %v522_v35 = vpop.f32.mrf.mxu0 }
 0x113   :  { %v179_v36 = vadd.f32 %v522_v35, %v427_v34 }
 0x114   :  { %v173_v37 = vpop.f32.mrf.mxu0 }
 0x115   :  { %v429_v38 = vmul.f32 -1.442695, %v179_v36  ;;  %v174_v39 = vadd.f32 %v427_v34, %v173_v37 }
 0x117   :  { %600 = vpow2.f32 %v429_v38  ;;  %v428_v40 = vmul.f32 -1.442695, %v174_v39 }
 0x119   :  { %602 = vpow2.f32 %v428_v40 }
 0x124   :  { %v601_v41 = vpop.eup %600 }
 0x125   :  { %v189_v42 = vadd.f32 1.0, %v601_v41 }
 0x126   :  { %v603_v43 = vpop.eup %602 }
 0x127   :  { %v188_v44 = vadd.f32 1.0, %v603_v43  ;;  %604 = vrcp.f32 %v189_v42 }
 0x129   :  { %606 = vrcp.f32 %v188_v44 }
 0x134   :  { %v605_v45 = vpop.eup %604 }
 0x135   :  { %v195_v48 = vmul.f32 %v605_v45, %v179_v36 }
 0x136   :  { %v607_v46 = vpop.eup %606 }
 0x137   :  { %v194_v47 = vmul.f32 %v607_v46, %v174_v39 }
 0x139   :  { %555 = vmatprep.mubr.f32.mxu1 %v194_v47 }
 0x13a   :  { %556 = vmatmul.mubr.f32.vlgmr.msra.gmra.mxu1 %v195_v48 }
 0x1fa   :  { %v557_v2 = vpop.f32.mrf.mxu1 }
 0x1fb   :  { %v291_v3 = vadd.f32 %v557_v2, %v430_v1 }
 0x1fc   :  { %v285_v4 = vpop.f32.mrf.mxu1 }
 0x1fd   :  { %v432_v5 = vmul.f32 -1.442695, %v291_v3  ;;  %v286_v6 = vadd.f32 %v430_v1, %v285_v4 }
 0x1ff   :  { %608 = vpow2.f32 %v432_v5  ;;  %v431_v7 = vmul.f32 -1.442695, %v286_v6 }
 0x201   :  { %610 = vpow2.f32 %v431_v7 }
 0x20c   :  { %v609_v8 = vpop.eup %608 }
 0x20d   :  { %v301_v9 = vadd.f32 1.0, %v609_v8 }
 0x20e   :  { %v611_v10 = vpop.eup %610 }
 0x20f   :  { %v300_v11 = vadd.f32 1.0, %v611_v10  ;;  %612 = vrcp.f32 %v301_v9 }
 0x211   :  { %614 = vrcp.f32 %v300_v11 }
 0x21c   :  { %v613_v12 = vpop.eup %612 }
 0x21d   :  { %v307_v15 = vmul.f32 %v613_v12, %v291_v3 }
 0x21e   :  { %v615_v13 = vpop.eup %614 }
 0x21f   :  { %v306_v14 = vmul.f32 %v615_v13, %v286_v6 }
 0x221   :  { %590 = vmatprep.mubr.f32.mxu0 %v306_v14 }
 0x222   :  { %591 = vmatmul.mubr.f32.vlgmr.msra.gmra.mxu0 %v307_v15 }
 0x2e2   :  { %v592_v17 = vpop.f32.mrf.mxu0 }
 0x2e3   :  { %v403_v18 = vadd.f32 %v592_v17, %v433_v16 }
 0x2e4   :  { %v397_v19 = vpop.f32.mrf.mxu0 }
 0x2e5   :  { %407 = vst [vmem:[#allocation10 + $0x8] sm:$0xff] %v403_v18  ;;  %v398_v20 = vadd.f32 %v433_v16, %v397_v19 }
 0x2e7   :  { %406 = vst [vmem:[#allocation10] sm:$0xff] %v398_v20 }
 0x2e8   :  { %707 = shalt.err (!%p704_p10)
}
 0x2e9   :  { %419 = dma.vmem_to_hbm [thread:$0]  %s414_s24, 256, %s817_s7, [#allocation4], %s726_s29, %s726_s29, %s727_s30  }
 0x2ea   :  { %722 = dma.done.wait [#allocation4], 256  }
 0x2eb   :  { %723 = vsyncadd [#allocation4], 4294967040 }
 0x2ec   :  { %423 = vsyncpa [#allocation3], 1 }
 0x2ed   :  { %424 = vsyncpa [#allocation6], 1 }
 0x2ee   :  { %425 = vsyncpa [#allocation9], 1 }
 0x2ef   :  { %426 = vsyncpa [#allocation4], 1 }

</bundles_post_ra>
